<compile_context>
chip_gen: v5e
topology: v5e:2x2
jax: 0.10.0
libtpu: 0.0.40
codegen_flags: <defaults>
</compile_context>

<pallas_src>
import numpy as np
import jax
import jax.numpy as jnp
from jax.experimental import pallas as pl
from jax.experimental.pallas import tpu as pltpu


# ----------------------------- graph setup (plain numpy glue) -----------------------------
def get_smpl_skeleton():
    return np.array([[0, 1], [0, 2], [0, 3], [1, 4], [2, 5], [3, 6], [4, 7],
                     [5, 8], [6, 9], [7, 10], [8, 11], [9, 12], [9, 13], [9, 14],
                     [12, 15], [13, 16], [14, 17], [16, 18], [17, 19], [18, 20],
                     [19, 21], [20, 22], [21, 23]])


def get_smpl_adj():
    skeleton = get_smpl_skeleton()
    num_joint = len(skeleton) + 1
    adj = np.zeros((num_joint, num_joint))
    for r, c in skeleton:
        adj[r, c] = 1.0
        adj[c, r] = 1.0
    for i in range(len(adj)):
        adj[i, i] = 1.0
    adj = adj / (np.sum(adj, axis=0, keepdims=True) + 1e-09)
    return adj


# ----------------------------- Pallas kernel -----------------------------
def gconv_kernel(x_ref, adj_ref, wbd_ref, badj_ref, o_ref):
    # x_ref:    (B*C_in, J)        batch-flattened input (rows ordered (b, c))
    # adj_ref:  (J, J)             column-normalized adjacency
    # wbd_ref:  (B*C_out, B*C_in)  block-diagonal Conv1d(k=1) weight
    # badj_ref: (B*C_out, J)       bias folded through adj: bias[o] * colsum(adj)[j]
    # o_ref:    (B*C_out, J)       rows ordered (b, o)
    #
    # Reassociated & bias-folded:  (W x + b 1^T) adj == W (x adj) + b (1^T adj)
    xa = jnp.dot(x_ref[...], adj_ref[...],
                 preferred_element_type=jnp.float32)              # (B*C_in, J)
    o_ref[...] = (jnp.dot(wbd_ref[...], xa,
                          preferred_element_type=jnp.float32)     # (B*C_out, J)
                  + badj_ref[...]).astype(o_ref.dtype)


def graph_convolution(x, weight, bias, adj):
    """x: (B, C_in, J) f32, weight: (C_out, C_in), bias: (C_out,), adj: (J, J)
       -> (B, C_out, J) f32."""
    B, C_in, J = x.shape
    C_out = weight.shape[0]

    # ---- wrapper-side layout plumbing (plain JAX, outside the kernel) ----
    x_flat = x.reshape(B * C_in, J)                               # contiguous flatten
    # Block-diagonal weight fuses the per-batch channel mix into one MXU matmul.
    # TODO(synk): for large B, reintroduce a "parallel" batch-chunk grid axis (v7x
    # megacore) instead of growing the block-diagonal weight quadratically with B.
    w_bd = jnp.kron(jnp.eye(B, dtype=weight.dtype), weight)       # (B*C_out, B*C_in)
    # Exact bias fold through the adjacency (colsum includes the 1e-9 regularizer).
    badj = bias[:, None] * jnp.sum(adj, axis=0)[None, :]          # (C_out, J)
    badj_tiled = jnp.tile(badj, (B, 1))                           # (B*C_out, J)

    out_flat = pl.pallas_call(
        gconv_kernel,
        out_shape=jax.ShapeDtypeStruct((B * C_out, J), jnp.float32),
        # Whole-array VMEM residency, single kernel invocation (no grid): total
        # working set is <2 KiB, so everything stays resident and we pay the
        # per-step overhead exactly once.
        in_specs=[
            pl.BlockSpec(memory_space=pltpu.MemorySpace.VMEM),    # x_flat
            pl.BlockSpec(memory_space=pltpu.MemorySpace.VMEM),    # adj
            pl.BlockSpec(memory_space=pltpu.MemorySpace.VMEM),    # w_bd
            pl.BlockSpec(memory_space=pltpu.MemorySpace.VMEM),    # badj
        ],
        out_specs=pl.BlockSpec(memory_space=pltpu.MemorySpace.VMEM),
    )(x_flat, adj, w_bd, badj_tiled)

    return out_flat.reshape(B, C_out, J)


# ----------------------------- reference (plain JAX) -----------------------------
def graph_convolution_ref(x, weight, bias, adj):
    h = jnp.einsum("oc,bcj->boj", weight, x) + bias[None, :, None]
    return jnp.einsum("bok,kj->boj", h, adj)


if __name__ == "__main__":
    key = jax.random.PRNGKey(0)
    k_x, k_w, k_b = jax.random.split(key, 3)

    B = 2
    C_in = 4
    C_out = 8
    J = 24  # number of SMPL joints, fixed by the adjacency matrix

    x = jax.random.normal(k_x, (B, C_in, J), dtype=jnp.float32)

    # Deterministic synthetic parameters (Conv1d(in, out, 1): weight (out, in), bias (out,)).
    bound = 1.0 / np.sqrt(C_in)
    weight = jax.random.uniform(k_w, (C_out, C_in), dtype=jnp.float32,
                                minval=-bound, maxval=bound)
    bias = jax.random.uniform(k_b, (C_out,), dtype=jnp.float32,
                              minval=-bound, maxval=bound)

    adj = jnp.asarray(get_smpl_adj(), dtype=jnp.float32)  # (24, 24)

    out = graph_convolution(x, weight, bias, adj)
    out = jax.block_until_ready(out)

    ref = graph_convolution_ref(x, weight, bias, adj)
    np.testing.assert_allclose(np.asarray(out), np.asarray(ref),
                               rtol=1e-5, atol=1e-5)

    print("KERNEL_OK")
</pallas_src>

<mosaic_0001>
module attributes {stable_mosaic.version = 11 : i64} {
  func.func @gconv_kernel(%arg0: memref<8x24xf32, #tpu.memory_space<vmem>>, %arg1: memref<24x24xf32, #tpu.memory_space<vmem>>, %arg2: memref<16x8xf32, #tpu.memory_space<vmem>>, %arg3: memref<16x24xf32, #tpu.memory_space<vmem>>, %arg4: memref<16x24xf32, #tpu.memory_space<vmem>>) attributes {dimension_semantics = [], scalar_prefetch = 0 : i64, scratch_operands = 0 : i64, tpu.core_type = #tpu.core_type<tc>} {
    %c0 = arith.constant 0 : index
    %c0_0 = arith.constant 0 : index
    %0 = vector.load %arg0[%c0, %c0_0] : memref<8x24xf32, #tpu.memory_space<vmem>>, vector<8x24xf32>
    %c0_1 = arith.constant 0 : index
    %c0_2 = arith.constant 0 : index
    %1 = vector.load %arg1[%c0_1, %c0_2] : memref<24x24xf32, #tpu.memory_space<vmem>>, vector<24x24xf32>
    %cst = arith.constant dense<0.000000e+00> : vector<8x24xf32>
    %2 = tpu.matmul %0, %1, %cst {dimension_numbers = #tpu.dot_dimension_numbers<[1], [0], [0], [1], [0, 0, 1, 1], [], []>} : vector<8x24xf32>, vector<24x24xf32>, vector<8x24xf32> -> vector<8x24xf32>
    %c0_3 = arith.constant 0 : index
    %c0_4 = arith.constant 0 : index
    %3 = vector.load %arg2[%c0_3, %c0_4] : memref<16x8xf32, #tpu.memory_space<vmem>>, vector<16x8xf32>
    %cst_5 = arith.constant dense<0.000000e+00> : vector<16x24xf32>
    %4 = tpu.matmul %3, %2, %cst_5 {dimension_numbers = #tpu.dot_dimension_numbers<[1], [0], [0], [1], [0, 0, 1, 1], [], []>} : vector<16x8xf32>, vector<8x24xf32>, vector<16x24xf32> -> vector<16x24xf32>
    %c0_6 = arith.constant 0 : index
    %c0_7 = arith.constant 0 : index
    %5 = vector.load %arg3[%c0_6, %c0_7] : memref<16x24xf32, #tpu.memory_space<vmem>>, vector<16x24xf32>
    %6 = arith.addf %4, %5 : vector<16x24xf32>
    %c0_8 = arith.constant 0 : index
    %c0_9 = arith.constant 0 : index
    %7 = vector.load %arg4[%c0_8, %c0_9] : memref<16x24xf32, #tpu.memory_space<vmem>>, vector<16x24xf32>
    tpu.vector_store %arg4[%c0_8, %c0_9], %6 {strides = array<i32>} : memref<16x24xf32, #tpu.memory_space<vmem>>, vector<16x24xf32>,
    return
  }
}

</mosaic_0001>

<bundles_post_ra>
// kernel: tpu_custom_call.1
= control target key start
LH: loop header
LB: loop body
LE: loop exit
PB: predicated region body
PF: predicated region fallthrough
CT: control target
= control target key end

     0   :  { %9 = vsyncpa [#allocation3], 0  ;;  %s282_s0 = inlined_call_operand.hbm [shape: f32[8,24], index: 0, kind: input, shape index: {}]   ;;  %s283_s1 = inlined_call_operand.vmem [shape: f32[24,24], index: 1, kind: input, shape index: {}]   ;;  %s284_s2 = inlined_call_operand.vmem [shape: f32[16,8], index: 2, kind: input, shape index: {}]   ;;  %s285_s3 = inlined_call_operand.hbm [shape: f32[16,24], index: 3, kind: input, shape index: {}]   ;;  %s286_s4 = inlined_call_operand.hbm [shape: f32[16,24], index: 4, kind: output, shape index: {}]  }
   0x1   :  { %10 = vsyncpa [#allocation6], 0 }
   0x2   :  { %11 = vsyncpa [#allocation4], 0  ;;  %s17_s17 = sshll.u32 %s282_s0, 4  ;;  %s219_s18 = smov [#allocation2]   ;;  %s18_s17 = int_to_ptr.hbm [resolvable:$true] %s17_s17 }
   0x3   :  { %s19_s19 = sshll.u32 %s219_s18, 4  ;;  %s31_s22 = sshll.u32 %s285_s3, 4  ;;  %s20_s19 = int_to_ptr.vmem [resolvable:$true] %s19_s19  ;;  %s32_s22 = int_to_ptr.hbm [resolvable:$true] %s31_s22 }
   0x4   :  { %22 = dma.hbm_to_vmem [thread:$0]  %s18_s17, 128, %s20_s19, [#allocation3]  }
   0x5   :  { %s220_s23 = smov [#allocation5]   ;;  %s221_s25 = smov 128  }
   0x6   :  { %s33_s24 = sshll.u32 %s220_s23, 4  ;;  %s222_s26 = smov 8   ;;  %s34_s24 = int_to_ptr.vmem [resolvable:$true] %s33_s24 }
   0x7   :  { %39 = dma.hbm_to_vmem [thread:$0]  %s32_s22, 256, %s34_s24, [#allocation6], %s221_s25, %s221_s25, %s222_s26  }
   0x8   :  { %213 = dma.done.wait [#allocation3], 128  }
   0x9   :  { %214 = vsyncadd [#allocation3], 4294967168 }
   0xa   :  { %215 = dma.done.wait [#allocation6], 256  }
   0xb   :  { %216 = vsyncadd [#allocation6], 4294967040  ;;  %v51_v0 = vld [vmem:[%s283_s1 + $0x10] sm:$0xff]  ;;  %v50_v1 = vld [vmem:[%s283_s1 + $0x8] sm:$0xff]  ;;  %vm52_vm0 = vcmask 195584   ;;  %vm80_vm1 = vcmask 64512  }
   0xc   :  { %69 = vmatpush.msra.mxu0 %v51_v0  ;;  %v49_v2 = vld [vmem:[%s283_s1] sm:$0xff]  ;;  %v77_v4 = vld [vmem:[%s284_s2 + $0x8] sm:$0xff]  ;;  %v79_v10 = vld [vmem:[#allocation5 + $0x8] sm:$0xff]  ;;  %s223_s1 = smov [#allocation7]   ;;  %s118_s12 = sshll.u32 %s286_s4, 4  ;;  %s119_s12 = int_to_ptr.hbm [resolvable:$true] %s118_s12 }
   0xd   :  { %v48_v3 = vld [vmem:[#allocation2] sm:$0xff]  ;;  %v78_v7 = vld [vmem:[#allocation5] sm:$0xff]  ;;  %s116_s9 = sshll.u32 %s223_s1, 4  ;;  %s117_s9 = int_to_ptr.vmem [resolvable:$true] %s116_s9 }
   0xe   :  { %70 = vmatpush.msra.mxu0 %v50_v1  ;;  %v76_v5 = vld [vmem:[%s284_s2] sm:$0xff] }
  0x10   :  { %71 = vmatpush.msra.mxu0 %v49_v2 }
  0x11   :  { %132 = vmatmul.msk.f32.vlgmr.msra.gmra.mxu0 %vm52_vm0, %v48_v3 }
  0x8e   :  { %v73_v6 = vpop.f32.mrf.mxu0 }
  0x8f   :  { %102 = vmatpush.msra.mxu1 %v73_v6  ;;  %135 = vmatpush.msra.mxu2 %v73_v6 }
  0x90   :  { %134 = vmatmul.msk.f32.vlgmr.msra.gmra.mxu2 %vm80_vm1, %v77_v4  ;;  %133 = vmatmul.msk.f32.vlgmr.msra.gmra.mxu1 %vm80_vm1, %v76_v5 }
 0x10d   :  { %v104_v8 = vpop.f32.mrf.mxu1 }
 0x10e   :  { %v105_v9 = vadd.f32 %v104_v8, %v78_v7 }
 0x110   :  { %110 = vst.msk [vmem:[#allocation7] sm:$0xff] %vm52_vm0, %v105_v9 }
 0x113   :  { %v107_v11 = vpop.f32.mrf.mxu2 }
 0x114   :  { %v108_v12 = vadd.f32 %v107_v11, %v79_v10 }
 0x116   :  { %111 = vst.msk [vmem:[#allocation7 + $0x8] sm:$0xff] %vm52_vm0, %v108_v12 }
 0x117   :  { %124 = dma.vmem_to_hbm [thread:$0]  %s117_s9, 256, %s119_s12, [#allocation4], %s221_s25, %s221_s25, %s222_s26  }
 0x118   :  { %217 = dma.done.wait [#allocation4], 256  }
 0x119   :  { %218 = vsyncadd [#allocation4], 4294967040 }
 0x11a   :  { %129 = vsyncpa [#allocation3], 1 }
 0x11b   :  { %130 = vsyncpa [#allocation6], 1 }
 0x11c   :  { %131 = vsyncpa [#allocation4], 1 }

</bundles_post_ra>
